<compile_context>
chip_gen: v7x
topology: tpu7x:2x2x1
jax: 0.10.0
libtpu: 0.0.40
codegen_flags: <defaults>
</compile_context>

<pallas_src>
import functools

import jax
import jax.numpy as jnp
import numpy as np
from jax import lax
from jax.experimental import pallas as pl
from jax.experimental.pallas import tpu as pltpu

_SUPPORTED_LIKELIHOOD = ('binary_logistic', 'poisson', 'gaussian')

# Explicit scoped-VMEM allowances (safe on v5e/v6e 128 MiB and v7x 64 MiB).
_PRED_VMEM_LIMIT = 32 * 1024 * 1024
_PREC_VMEM_LIMIT = 48 * 1024 * 1024


def _pick_tile(dim, target):
    """Largest multiple-of-128 divisor of `dim` that is <= target, else `dim`."""
    if dim <= target:
        return dim
    t = (target // 128) * 128
    while t >= 128:
        if dim % t == 0:
            return t
        t -= 128
    # TODO(synk): dims not divisible by 128 fall back to a single full-extent
    # block; for very large unaligned dims pad upstream instead.
    return dim


# ----------------------------- Pallas kernels ----------------------------- #

def _precision_kernel(phi_i_ref, phi_j_ref, prec_ref, out_ref, *,
                      momentum, scale):
    """One (TI, TJ) tile of: new_prec = m*prec + ((1-m)/B) * Phi^T Phi
       (or prec + Phi^T Phi when momentum <= 0)."""
    # Contract the batch axis directly -- no transposed copy of Phi.
    bp = lax.dot_general(phi_i_ref[...], phi_j_ref[...],
                         (((0,), (0,)), ((), ())),
                         preferred_element_type=jnp.float32)
    prec = prec_ref[...].astype(jnp.float32)
    if momentum > 0:
        new = momentum * prec + scale * bp          # scale = (1-m)/B, folded
    else:
        new = prec + bp
    out_ref[...] = new.astype(out_ref.dtype)


def _precision_kernel_lik(logits_ref, phi_i_ref, phi_j_ref, prec_ref, out_ref,
                          *, momentum, scale, likelihood):
    """Same as above but with the Laplace multiplier D folded into ONE operand:
       Phi^T D Phi == (D @ Phi)_i^T @ Phi_j  (no sqrt, no scaling of phi_j)."""
    logits = logits_ref[...].astype(jnp.float32)        # (B, 1), f32 on VPU
    if likelihood == 'binary_logistic':
        prob = 1.0 / (1.0 + jnp.exp(-logits))
        mult = prob * (1.0 - prob)
    else:  # poisson
        # TODO(synk): exp(logits) overflows for very large logits, matching the
        # PyTorch reference behaviour (unguarded there too).
        mult = jnp.exp(logits)
    mm_dtype = phi_i_ref.dtype                          # feed MXU in native dtype
    phi_i = (mult * phi_i_ref[...].astype(jnp.float32)).astype(mm_dtype)
    bp = lax.dot_general(phi_i, phi_j_ref[...],
                         (((0,), (0,)), ((), ())),
                         preferred_element_type=jnp.float32)
    prec = prec_ref[...].astype(jnp.float32)
    if momentum > 0:
        new = momentum * prec + scale * bp
    else:
        new = prec + bp
    out_ref[...] = new.astype(out_ref.dtype)


def _phi_cov_kernel(phi_ref, cov_ref, t_ref, acc_ref):
    """Pass 1: one (TM, TN) tile of T = Phi @ Cov, accumulated over H//TK."""
    @pl.when(pl.program_id(2) == 0)
    def _():
        acc_ref[...] = jnp.zeros_like(acc_ref)

    acc_ref[...] += jnp.dot(phi_ref[...], cov_ref[...],
                            preferred_element_type=jnp.float32)

    @pl.when(pl.program_id(2) == pl.num_programs(2) - 1)
    def _():
        t_ref[...] = acc_ref[...].astype(t_ref.dtype)


def _t_phit_kernel(t_ref, phi_ref, out_ref, acc_ref, *, ridge):
    """Pass 2: one (TM, TN) tile of S = ridge * T @ Phi^T, accumulated over H//TK.
       Contracts the shared K axis of both operands (no Phi^T materialization)."""
    @pl.when(pl.program_id(2) == 0)
    def _():
        acc_ref[...] = jnp.zeros_like(acc_ref)

    acc_ref[...] += lax.dot_general(t_ref[...], phi_ref[...],
                                    (((1,), (1,)), ((), ())),
                                    preferred_element_type=jnp.float32)

    @pl.when(pl.program_id(2) == pl.num_programs(2) - 1)
    def _():
        out_ref[...] = (ridge * acc_ref[...]).astype(out_ref.dtype)


# ----------------------------- Pallas wrappers ----------------------------- #

def precision_update(phi, precision, logits=None, *, momentum, likelihood,
                     tile_i=256, tile_j=1024):
    """Tiled in-place EMA / sum update of the (H, H) precision matrix."""
    B, H = phi.shape
    ti = _pick_tile(H, tile_i)
    tj = _pick_tile(H, tile_j)
    grid = (H // ti, H // tj)

    phi_i_spec = pl.BlockSpec((B, ti), lambda i, j: (0, i))
    phi_j_spec = pl.BlockSpec((B, tj), lambda i, j: (0, j))
    prec_spec = pl.BlockSpec((ti, tj), lambda i, j: (i, j))

    scale = (1.0 - momentum) / float(B) if momentum > 0 else 1.0

    if likelihood == 'gaussian':
        kernel = functools.partial(_precision_kernel,
                                   momentum=momentum, scale=scale)
        in_specs = [phi_i_spec, phi_j_spec, prec_spec]
        args = (phi, phi, precision)
        alias = {2: 0}        # precision input aliased onto the output
    else:
        kernel = functools.partial(_precision_kernel_lik,
                                   momentum=momentum, scale=scale,
                                   likelihood=likelihood)
        in_specs = [pl.BlockSpec((B, 1), lambda i, j: (0, 0)),
                    phi_i_spec, phi_j_spec, prec_spec]
        args = (logits, phi, phi, precision)
        alias = {3: 0}

    return pl.pallas_call(
        kernel,
        grid=grid,
        in_specs=in_specs,
        out_specs=pl.BlockSpec((ti, tj), lambda i, j: (i, j)),
        out_shape=jax.ShapeDtypeStruct((H, H), precision.dtype),
        input_output_aliases=alias,
        compiler_params=pltpu.CompilerParams(
            dimension_semantics=("parallel", "parallel"),
            vmem_limit_bytes=_PREC_VMEM_LIMIT),
    )(*args)


def predictive_covariance(phi, covariance, *, ridge_penalty,
                          tile_m=256, tile_n=256, tile_k=256):
    """ridge * Phi @ Cov @ Phi^T -> (B, B) in two tiled matmul passes."""
    B, H = phi.shape
    mm_dtype = phi.dtype
    # Cast Cov once so the MXU sees matched-dtype operands; no-op for f32 Phi.
    cov = covariance.astype(mm_dtype)

    # Cap tm/tn so the parallel output axes have >= 2 blocks when B permits
    # (keeps both v7x TensorCores busy for larger eval batches).
    tm = _pick_tile(B, min(tile_m, max(128, B // 2)))
    tn_h = _pick_tile(H, tile_n)                               # pass-1 cols (over H)
    tn_b = _pick_tile(B, min(tile_n, max(128, B // 2)))        # pass-2 cols (over B)
    tk = _pick_tile(H, tile_k)

    # ---- pass 1: T = Phi @ Cov, shape (B, H) ------------------------------ #
    # Intentional precision note: T is stored in Phi's dtype (bf16 when Phi is
    # bf16) before the second matmul.
    t_mat = pl.pallas_call(
        _phi_cov_kernel,
        grid=(B // tm, H // tn_h, H // tk),
        in_specs=[pl.BlockSpec((tm, tk), lambda i, n, k: (i, k)),
                  pl.BlockSpec((tk, tn_h), lambda i, n, k: (k, n))],
        out_specs=pl.BlockSpec((tm, tn_h), lambda i, n, k: (i, n)),
        out_shape=jax.ShapeDtypeStruct((B, H), mm_dtype),
        scratch_shapes=[pltpu.VMEM((tm, tn_h), jnp.float32)],
        compiler_params=pltpu.CompilerParams(
            dimension_semantics=("parallel", "parallel", "arbitrary"),
            vmem_limit_bytes=_PRED_VMEM_LIMIT),
    )(phi, cov)

    # ---- pass 2: S = ridge * T @ Phi^T, shape (B, B) ---------------------- #
    kernel = functools.partial(_t_phit_kernel, ridge=float(ridge_penalty))
    return pl.pallas_call(
        kernel,
        grid=(B // tm, B // tn_b, H // tk),
        in_specs=[pl.BlockSpec((tm, tk), lambda i, j, k: (i, k)),
                  pl.BlockSpec((tn_b, tk), lambda i, j, k: (j, k))],
        out_specs=pl.BlockSpec((tm, tn_b), lambda i, j, k: (i, j)),
        out_shape=jax.ShapeDtypeStruct((B, B), mm_dtype),
        scratch_shapes=[pltpu.VMEM((tm, tn_b), jnp.float32)],
        compiler_params=pltpu.CompilerParams(
            dimension_semantics=("parallel", "parallel", "arbitrary"),
            vmem_limit_bytes=_PRED_VMEM_LIMIT),
    )(t_mat, phi)


# --------------------------- Module-equivalent ----------------------------- #

class LaplaceRandomFeatureCovariance:
    """JAX/Pallas port of the PyTorch LaplaceRandomFeatureCovariance module."""

    def __init__(self, in_features, momentum=0.999, ridge_penalty=1.0,
                 likelihood='gaussian', dtype=jnp.float32,
                 tile_hh_i=256, tile_hh_j=1024,
                 tile_bm=256, tile_bn=256, tile_bk=256):
        if likelihood not in _SUPPORTED_LIKELIHOOD:
            raise ValueError(
                f'"likelihood" must be one of {_SUPPORTED_LIKELIHOOD}, got {likelihood}.')
        self.in_features = in_features
        self.momentum = momentum
        self.ridge_penalty = ridge_penalty
        self.likelihood = likelihood
        self.dtype = dtype
        self.tile_hh_i = tile_hh_i
        self.tile_hh_j = tile_hh_j
        self.tile_bm = tile_bm
        self.tile_bn = tile_bn
        self.tile_bk = tile_bk
        # Precision/covariance buffers stay f32: with momentum=0.999 the EMA
        # increment would vanish under bf16 rounding.
        buf_dtype = jnp.float32
        self.init_precision = ridge_penalty * jnp.eye(in_features, dtype=buf_dtype)
        self._precision = ridge_penalty * jnp.eye(in_features, dtype=buf_dtype)
        self._covariance = ridge_penalty * jnp.eye(in_features, dtype=buf_dtype)
        self.covariance_is_cached = False
        self.training = True

    @property
    def precision(self):
        return self._precision

    @precision.setter
    def precision(self, val):
        self.covariance_is_cached = False
        self._precision = val

    @property
    def covariance(self):
        if not self.covariance_is_cached:
            # TODO(synk): dense matrix inversion has no clean Pallas TPU
            # equivalent; kept in plain JAX (XLA) like torch.linalg.inv.
            self._covariance = jnp.linalg.inv(self._precision)
            self.covariance_is_cached = True
        return self._covariance

    @covariance.setter
    def covariance(self, val):
        self._covariance = val

    def update_precision(self, Phi, logits=None):
        if self.likelihood != 'gaussian':
            if logits is None:
                raise ValueError(
                    f'"logits" cannot be None when likelihood={self.likelihood}')
            if logits.shape[-1] != 1:
                raise ValueError(
                    f'likelihood={self.likelihood} only supports univariate logits. '
                    f'Got logits dimension: {logits.shape[-1]}')
        self.precision = precision_update(
            Phi, self._precision,
            logits if self.likelihood != 'gaussian' else None,
            momentum=self.momentum, likelihood=self.likelihood,
            tile_i=self.tile_hh_i, tile_j=self.tile_hh_j)
        return self

    def reset_precision(self):
        self.precision = self.init_precision

    def compute_predictive_covariance(self, Phi):
        return predictive_covariance(
            Phi, self.covariance, ridge_penalty=self.ridge_penalty,
            tile_m=self.tile_bm, tile_n=self.tile_bn, tile_k=self.tile_bk)

    def forward(self, Phi, logits=None):
        batch_size = Phi.shape[0]
        if self.training:
            self.update_precision(Phi=Phi, logits=logits)
            return jnp.eye(batch_size, dtype=Phi.dtype)
        return self.compute_predictive_covariance(Phi=Phi)

    __call__ = forward


# ----------------------------------- main ---------------------------------- #

if __name__ == "__main__":
    B, H = 16, 256  # batch_size, gp_hidden_size (= in_features); small demo shapes
    key = jax.random.PRNGKey(0)
    k1, k2 = jax.random.split(key)
    Phi = jax.random.normal(k1, (B, H), dtype=jnp.float32)
    logits = jax.random.normal(k2, (B, 1), dtype=jnp.float32)

    # --- gaussian likelihood, EMA (momentum > 0) update -------------------- #
    mod = LaplaceRandomFeatureCovariance(
        in_features=H, momentum=0.999, ridge_penalty=1.0, likelihood='gaussian',
        tile_hh_i=128, tile_hh_j=128, tile_bm=128, tile_bn=128, tile_bk=128)

    mod.training = True
    eye_out = jax.block_until_ready(mod(Phi))     # updates precision, returns eye(B)
    prec = jax.block_until_ready(mod.precision)

    mod.training = False
    cov_out = jax.block_until_ready(mod(Phi))     # (B, B) predictive covariance

    # Reference (plain JAX) check of the forward-pass semantics.
    m, ridge = 0.999, 1.0
    prec0 = ridge * jnp.eye(H, dtype=jnp.float32)
    prec_ref = m * prec0 + (1.0 - m) * (Phi.T @ Phi) / B
    cov_ref = ridge * Phi @ jnp.linalg.inv(prec_ref) @ Phi.T

    np.testing.assert_allclose(np.asarray(eye_out), np.eye(B, dtype=np.float32),
                               rtol=1e-5, atol=1e-5)
    np.testing.assert_allclose(np.asarray(prec), np.asarray(prec_ref),
                               rtol=1e-4, atol=1e-4)
    np.testing.assert_allclose(np.asarray(cov_out), np.asarray(cov_ref),
                               rtol=1e-3, atol=1e-3)

    # --- binary_logistic likelihood, momentum=-1 (plain sum) update --------- #
    mod2 = LaplaceRandomFeatureCovariance(
        in_features=H, momentum=-1, ridge_penalty=1.0,
        likelihood='binary_logistic', tile_hh_i=128, tile_hh_j=128)
    mod2.training = True
    _ = jax.block_until_ready(mod2(Phi, logits))
    prec2 = jax.block_until_ready(mod2.precision)

    prob = jax.nn.sigmoid(logits)
    sphi = jnp.sqrt(prob * (1.0 - prob)) * Phi
    prec2_ref = prec0 + sphi.T @ sphi
    np.testing.assert_allclose(np.asarray(prec2), np.asarray(prec2_ref),
                               rtol=1e-4, atol=1e-4)

    # --- poisson likelihood, EMA update ------------------------------------- #
    mod3 = LaplaceRandomFeatureCovariance(
        in_features=H, momentum=0.99, ridge_penalty=1.0,
        likelihood='poisson', tile_hh_i=128, tile_hh_j=128)
    mod3.training = True
    _ = jax.block_until_ready(mod3(Phi, logits))
    prec3 = jax.block_until_ready(mod3.precision)

    pphi = jnp.sqrt(jnp.exp(logits)) * Phi
    prec3_ref = 0.99 * prec0 + 0.01 * (pphi.T @ pphi) / B
    np.testing.assert_allclose(np.asarray(prec3), np.asarray(prec3_ref),
                               rtol=1e-4, atol=1e-4)

    print("KERNEL_OK")
</pallas_src>

<mosaic_0001>
module attributes {stable_mosaic.version = 11 : i64} {
  func.func @_precision_kernel(%arg0: i32, %arg1: i32, %arg2: memref<16x128xf32, #tpu.memory_space<vmem>>, %arg3: memref<16x128xf32, #tpu.memory_space<vmem>>, %arg4: memref<128x128xf32, #tpu.memory_space<vmem>>, %arg5: memref<128x128xf32, #tpu.memory_space<vmem>>) attributes {dimension_semantics = [#tpu.dimension_semantics<parallel>, #tpu.dimension_semantics<parallel>], iteration_bounds = array<i64: 2, 2>, scalar_prefetch = 0 : i64, scratch_operands = 0 : i64, tpu.core_type = #tpu.core_type<tc>, window_params = [{transform_indices = @transform_0, window_bounds = array<i64: 16, 128>}, {transform_indices = @transform_1, window_bounds = array<i64: 16, 128>}, {transform_indices = @transform_2, window_bounds = array<i64: 128, 128>}, {transform_indices = @transform_3, window_bounds = array<i64: 128, 128>}]} {
    %c0 = arith.constant 0 : index
    %c0_0 = arith.constant 0 : index
    %0 = vector.load %arg2[%c0, %c0_0] : memref<16x128xf32, #tpu.memory_space<vmem>>, vector<16x128xf32>
    %c0_1 = arith.constant 0 : index
    %c0_2 = arith.constant 0 : index
    %1 = vector.load %arg3[%c0_1, %c0_2] : memref<16x128xf32, #tpu.memory_space<vmem>>, vector<16x128xf32>
    %cst = arith.constant dense<0.000000e+00> : vector<128x128xf32>
    %2 = tpu.matmul %0, %1, %cst {dimension_numbers = #tpu.dot_dimension_numbers<[0], [0], [1], [1], [0, 1, 1, 1], [], []>} : vector<16x128xf32>, vector<16x128xf32>, vector<128x128xf32> -> vector<128x128xf32>
    %c0_3 = arith.constant 0 : index
    %c0_4 = arith.constant 0 : index
    %3 = vector.load %arg4[%c0_3, %c0_4] : memref<128x128xf32, #tpu.memory_space<vmem>>, vector<128x128xf32>
    %cst_5 = arith.constant 9.990000e-01 : f32
    %4 = vector.broadcast %cst_5 : f32 to vector<128x128xf32>
    %5 = arith.mulf %4, %3 : vector<128x128xf32>
    %cst_6 = arith.constant 6.250000e-05 : f32
    %6 = vector.broadcast %cst_6 : f32 to vector<128x128xf32>
    %7 = arith.mulf %6, %2 : vector<128x128xf32>
    %8 = arith.addf %5, %7 : vector<128x128xf32>
    %c0_7 = arith.constant 0 : index
    %c0_8 = arith.constant 0 : index
    %9 = vector.load %arg5[%c0_7, %c0_8] : memref<128x128xf32, #tpu.memory_space<vmem>>, vector<128x128xf32>
    tpu.vector_store %arg5[%c0_7, %c0_8], %8 {strides = array<i32>} : memref<128x128xf32, #tpu.memory_space<vmem>>, vector<128x128xf32>,
    return
  }
  func.func @transform_0(%arg0: i32, %arg1: i32) -> (i32, i32) {
    %c0_i32 = arith.constant 0 : i32
    %c0_i32_0 = arith.constant 0 : i32
    return %c0_i32, %arg0 : i32, i32
  }
  func.func @transform_1(%arg0: i32, %arg1: i32) -> (i32, i32) {
    %c0_i32 = arith.constant 0 : i32
    %c0_i32_0 = arith.constant 0 : i32
    return %c0_i32, %arg1 : i32, i32
  }
  func.func @transform_2(%arg0: i32, %arg1: i32) -> (i32, i32) {
    %c0_i32 = arith.constant 0 : i32
    return %arg0, %arg1 : i32, i32
  }
  func.func @transform_3(%arg0: i32, %arg1: i32) -> (i32, i32) {
    %c0_i32 = arith.constant 0 : i32
    return %arg0, %arg1 : i32, i32
  }
}

</mosaic_0001>

<bundles_post_ra>
// kernel: tpu_custom_call.1
= control target key start
LH: loop header
LB: loop body
LE: loop exit
PB: predicated region body
PF: predicated region fallthrough
CT: control target
= control target key end

     0   :  { %s1484_s0 = inlined_call_operand.vmem [shape: f32[16,256], index: 0, kind: input, shape index: {}]   ;;  %s1485_s1 = inlined_call_operand.vmem [shape: f32[16,256], index: 1, kind: input, shape index: {}]   ;;  %s1486_s2 = inlined_call_operand.hbm [shape: f32[256,256], index: 2, kind: input, shape index: {}, may-alias: {2,3}]   ;;  %s1487_s3 = inlined_call_operand.hbm [shape: f32[256,256], index: 3, kind: output, shape index: {}, may-alias: {2,3}]  }
   0x1   :  { %1493 = sst [smem:[#allocation17_spill]] %s1484_s0 }
   0x2   :  { %8 = vsyncpa [#allocation5], 0 }
   0x3   :  { %10 = vsyncpa [#allocation5 + $0x1], 0 }
   0x4   :  { %11 = vsyncpa [#allocation6], 0 }
   0x5   :  { %13 = vsyncpa [#allocation6 + $0x1], 0  ;;  %s1168_s12 = smov 0   ;;  %s1170_s13 = smov 0  }
   0x6   :  { %s1172_s14 = smov 0   ;;  %s1174_s15 = smov 0  }
   0x7   :  { %s1176_s16 = smov 0   ;;  %s1178_s17 = smov 0  }
   0x8   :  { %s1180_s18 = smov 0   ;;  %s1182_s19 = smov 0  }
   0x9   :  { %s1184_s20 = smov 0   ;;  %s1186_s21 = smov 0  }
   0xa   :  { %s1188_s22 = smov 0   ;;  %s1190_s23 = smov 0  }
   0xb LB: > { %1494 = sst [smem:[#allocation10_spill]] %s1118_s18  ;;  %s775_s24 = sadd.s32 4294967295, %s1138_s23   ;;  %s1138_s23 = sphi %s1190_s23, %s19_s23   ;;  %s1134_s22 = sphi %s1188_s22, %s1525_s22   ;;  %s1130_s21 = sphi %s1186_s21, %s1524_s21   ;;  %s1126_s20 = sphi %s1184_s20, %s1523_s20   ;;  %s1122_s19 = sphi %s1182_s19, %s1522_s19   ;;  %s1118_s18 = sphi %s1180_s18, %s1514_s18   ;;  %s1114_s17 = sphi %s1178_s17, %s1513_s17   ;;  %s1110_s16 = sphi %s1176_s16, %s1521_s16   ;;  %s1106_s15 = sphi %s1174_s15, %s1520_s15   ;;  %s1102_s14 = sphi %s1172_s14, %s1519_s14   ;;  %s1098_s13 = sphi %s1170_s13, %s1518_s13   ;;  %s1094_s12 = sphi %s1168_s12, %s1517_s12  }
   0xc   : > { %s776_s25 = sadd.s32 4294967294, %s1138_s23   ;;  %s28_s26 = sadd.s32 1, %s1130_s21 }
   0xd   : > { %s31_s27 = sadd.s32 1, %s1134_s22  ;;  %p29_p0 = scmp.ge.s32.totalorder %s28_s26, 2 }
   0xe   : > { %s38_s28 = sadd.s32 1, %s1118_s18  ;;  %p45_p1 = scmp.ne.s32.totalorder %s1118_s18, %s1114_s17 }
   0xf   : > { %p46_p2 = scmp.eq.s32.totalorder %s1138_s23, 0  ;;  %s1527_s26 = smov (%p29_p0, %s28_s26), 0 }
  0x10   : > { %1495 = sst [smem:[#allocation11_spill]] %s1527_s26  ;;  %s1529_s27 = smov (!%p29_p0, %s31_s27), %s1134_s22 }
  0x11   : > { %p1241_p3 = por %p46_p2, %p45_p1  ;;  %s61_s30 = ssub.s32 %s1130_s21, %s1527_s26 }
  0x12   : > { %p33_p4 = scmp.ge.s32.totalorder %s1529_s27, 2  ;;  %p62_p5 = scmp.eq.s32.totalorder %s61_s30, 0 }
  0x13   : > { %s64_s4 = sadd.s32 1, %s1110_s16  ;;  %p71_p6 = scmp.ne.s32.totalorder %s1110_s16, %s1106_s15 }
  0x14   : > { %s1531_s27 = smov (%p33_p4, %s1529_s27), 0  ;;  %s92_s9 = sadd.s32 1, %s1102_s14 }
  0x15   : > { %1497 = sst [smem:[#allocation12_spill]] %s1531_s27  ;;  %s35_s6 = ssub.s32 %s1134_s22, %s1531_s27 }
  0x16   : > { %s1253_s5 = scalar_select %p62_p5, %s1110_s16, %s64_s4  }
  0x17   : > { %p1259_p7 = por %p71_p6, %p46_p2  ;;  %p36_p8 = scmp.eq.s32.totalorder %s35_s6, 0 }
  0x18   : > { %1498 = sst [smem:[#allocation13_spill]] %s1253_s5  ;;  %s89_s8 = sor.u32 %s61_s30, %s35_s6 }
  0x19   : > { %p90_p9 = scmp.eq.s32.totalorder %s89_s8, 0  ;;  %p99_p10 = scmp.ne.s32.totalorder %s1102_s14, %s1098_s13 }
  0x1a   : > { %s1265_s10 = scalar_select %p36_p8, %s1118_s18, %s38_s28  }
  0x1b   : > { %s1268_s11 = scalar_select %p90_p9, %s1102_s14, %s92_s9  }
  0x1c   : > { %1500 = sst [smem:[#allocation14_spill]] %s1265_s10  ;;  %p105_p11 = scmp.ne.s32.totalorder %s1098_s13, %s1094_s12 }
  0x1d   : > { %1501 = sst [smem:[#allocation15_spill]] %s1268_s11  ;;  %p106_p12 = scmp.eq.s32.totalorder %s775_s24, 0 }
  0x1e   : > { %p131_p13 = scmp.eq.s32.totalorder %s775_s24, 3  ;;  %p1276_p0 = por %p99_p10, %p46_p2 }
  0x1f   : > { %p137_p1 = scmp.eq.s32.totalorder %s776_s25, 3  ;;  %p1280_p4 = por %p106_p12, %p105_p11 }
  0x20   : > { %p1284_p5 = por %p131_p13, %p99_p10  ;;  %p778_p8 = scmp.ge.s32.totalorder %s1138_s23, 4 }
  0x21   : > { %p1288_p6 = por %p137_p1, %p105_p11 }
  0x22   : > { %s1504_s30 = scalar_select %p1284_p5, 1, 0 }
  0x23   : > { %s1505_s28 = scalar_select %p1288_p6, 1, 0 }
  0x24   : > { %153 = sbr.rel (%p778_p8) target bundleno = 89 (0x59), region = 16 }
  0x25   : > { %1506 = sst [smem:[#allocation16_spill]] %s1505_s28 }
  0x2b   : > { %156 = sbr.rel (!%p1241_p3) target bundleno = 54 (0x36), region = 20  ;;  %s158_s24 = sand.u32 (%p1241_p3), 1, %s1118_s18  }
  0x2c   : > { %s780_s25 = sshll.u32 (%p1241_p3), %s1134_s22, 3  ;;  %s779_s6 = sshll.u32 (%p1241_p3), %s158_s24, 4 }
  0x2d   : > { %s1507_s0 = sld [smem:[#allocation17_spill]] (%p1241_p3)  ;;  %s160_s10 = scalar_lea.vmem (%p1241_p3), [#allocation2], %s779_s6 }
  0x33   : > { %s162_s26 = scalar_lea.vmem %s1507_s0, %s780_s25 }
  0x34   : > { %v192_v0 = vld [vmem:[%s162_s26] sm:$0xff]  ;;  %v194_v1 = vld [vmem:[%s162_s26 + $0x10] sm:$0xff] }
  0x35   : > { %193 = vst [vmem:[%s160_s10] sm:$0xff] %v192_v0  ;;  %195 = vst [vmem:[%s160_s10 + $0x8] sm:$0xff] %v194_v1 }
  0x36 PF: > { %201 = sbr.rel (!%p1259_p7) target bundleno = 61 (0x3d), region = 58  ;;  %s203_s29 = sand.u32 (%p1259_p7), 1, %s1110_s16  }
  0x37   : > { %s782_s5 = sshll.u32 (%p1259_p7), %s1130_s21, 3  ;;  %s781_s18 = sshll.u32 (%p1259_p7), %s203_s29, 4 }
  0x38   : > { %s207_s28 = scalar_lea.vmem (%p1259_p7), %s1485_s1, %s782_s5  ;;  %s205_s25 = scalar_lea.vmem (%p1259_p7), [#allocation3], %s781_s18 }
  0x39   : > { %v237_v2 = vld [vmem:[%s207_s28] sm:$0xff] (%p1259_p7)  ;;  %v239_v3 = vld [vmem:[%s207_s28 + $0x10] sm:$0xff] (%p1259_p7) }
  0x3a   : > { %238 = vst [vmem:[%s205_s25] sm:$0xff] (%p1259_p7), %v237_v2  ;;  %240 = vst [vmem:[%s205_s25 + $0x8] sm:$0xff] (%p1259_p7), %v239_v3 }
  0x3d PF: > { %s247_s26 = sand.u32 1, %s1102_s14   ;;  %s814_s7 = sshll.u32 %s1134_s22, 5 }
  0x3e   : > { %s783_s10 = sshll.u32 %s247_s26, 7  ;;  %s257_s6 = sadd.s32 %s1130_s21, %s814_s7 }
  0x3f   : > { %s786_s8 = sshll.u32 %s257_s6, 7  ;;  %s251_s9 = scalar_lea.vmem [#allocation4], %s783_s10 }
  0x40   : > { %s260_s29 = sshll.u32 %s251_s9, 4  ;;  %s1313_s5 = scalar_lea.hbm %s1486_s2, %s786_s8  ;;  %s1315_s29 = int_to_ptr.vmem [resolvable:$true] %s260_s29 }
  0x41   : > { %s1317_s18 = scalar_lea.sflag [#allocation5], %s247_s26  ;;  %s980_s28 = scalar_lea.hbm %s1313_s5, 2048 }
  0x42   : > { %p981_p2 = scmp.ne.s32.totalorder %s1313_s5, %s980_s28  ;;  %s984_s7 = scalar_lea.hbm %s1486_s2, 8192 }
  0x43   : > { %p985_p9 = scmp.lt.u32.totalorder %s1313_s5, %s1486_s2  ;;  %p986_p10 = scmp.lt.u32.totalorder %s984_s7, %s980_s28 }
  0x44   : > { %p982_p3 = pnand %p981_p2, %p1276_p0  ;;  %p988_p12 = scmp.lt.u32.totalorder %s980_s28, %s1313_s5 }
  0x45   : > { %p987_p11 = por %p986_p10, %p985_p9 }
  0x46   : > { %p983_p7 = pneg %p982_p3 }
  0x47   : > { %p989_p13 = por %p988_p12, %p987_p11 }
  0x49   : > { %p990_p1 = pnand %p989_p13, %p983_p7 }
  0x4b   : > { %993 = shalt.err (!%p990_p1)
}
  0x4c   : > { %s994_s26 = scalar_lea.vmem %s1315_s29, 2048  ;;  %s1140_s6 = smov [#allocation4]  }
  0x4d   : > { %p995_p8 = scmp.ne.s32.totalorder %s1315_s29, %s994_s26  ;;  %s998_s8 = sshll.u32 %s1140_s6, 4  ;;  %s999_s8 = int_to_ptr.vmem [resolvable:$false] %s998_s8 }
  0x4e   : > { %s1000_s9 = scalar_lea.vmem %s999_s8, 4096  ;;  %p1001_p6 = scmp.lt.s32.totalorder %s1315_s29, %s999_s8 }
  0x4f   : > { %p996_p2 = pnand %p995_p8, %p1276_p0  ;;  %p1002_p5 = scmp.lt.s32.totalorder %s1000_s9, %s994_s26 }
  0x51   : > { %p997_p3 = pneg %p996_p2  ;;  %p1003_p9 = por %p1002_p5, %p1001_p6 }
  0x53   : > { %p1004_p10 = pnand %p1003_p9, %p997_p3 }
  0x55   : > { %1007 = shalt.err (!%p1004_p10)
}
  0x56   : > { %s1141_s11 = smov 256   ;;  %s1142_s28 = smov 128  }
  0x57   : > { %s1143_s24 = smov 8  }
  0x58   : > { %868 = dma.hbm_to_vmem [thread:$0]  (%p1276_p0), %s1313_s5, 2048, %s1315_s29, %s1317_s18, %s1141_s11, %s1142_s28, %s1143_s24  }
  0x59 PF: > { %p787_p7 = scmp.ge.s32.totalorder %s1138_s23, 1  ;;  %p268_p11 = scmp.lt.s32.totalorder %s1138_s23, 5 }
  0x5b   : > { %p269_p12 = pnand %p787_p7, %p268_p11 }
  0x5c   : > { %s275_s25 = sand.u32 (!%p269_p12), 1, %s1114_s17   ;;  %s282_s7 = sand.u32 (!%p269_p12), 1, %s1106_s15  }
  0x5d   : > { %272 = sbr.rel (%p269_p12) target bundleno = 524 (0x20c), region = 100  ;;  %s788_s0 = sshll.u32 (!%p269_p12), %s275_s25, 4 }
  0x5e   : > { %s789_s10 = sshll.u32 (!%p269_p12), %s282_s7, 4  ;;  %s1346_s26 = sand.u32 (!%p269_p12), 1, %s1098_s13  }
  0x5f   : > { %s790_s4 = sshll.u32 (!%p269_p12), %s1346_s26, 7  ;;  %s277_s29 = scalar_lea.vmem (!%p269_p12), [#allocation2], %s788_s0 }
  0x60   : > { %s284_s5 = scalar_lea.vmem (!%p269_p12), [#allocation3], %s789_s10  ;;  %s289_s18 = scalar_lea.sflag (!%p269_p12), [#allocation5], %s1346_s26 }
  0x61   : > { %s1352_s6 = scalar_lea.vmem (!%p269_p12), [#allocation4], %s790_s4 }
  0x64   : > { %1085 = dma.done.wait (%p1280_p4), %s289_s18, 2048  }
  0x65   : > { %1087 = vsyncadd (%p1280_p4), %s289_s18, 4294965248  ;;  %v325_v4 = vld [vmem:[%s277_s29] sm:$0xff]  ;;  %v328_v6 = vld [vmem:[%s284_s5 + $0x8] sm:$0xff]  ;;  %vm361_vm0 = vcmask 130048   ;;  %s1379_s15 = scalar_lea.vmem [#allocation7], %s790_s4  ;;  %s815_s17 = sshll.u32 %s1126_s20, 5 }
  0x66   : > { %v327_v5 = vld [vmem:[%s284_s5] sm:$0xff]  ;;  %329 = vxpose.xlu0.b32.start [1/2] (short) %v325_v4, 128  ;;  %v326_v7 = vld [vmem:[%s277_s29 + $0x8] sm:$0xff]  ;;  %s648_s27 = sadd.s32 %s1122_s19, %s815_s17  ;;  %s651_s9 = sshll.u32 %s1379_s15, 4  ;;  %s1416_s9 = int_to_ptr.vmem [resolvable:$true] %s651_s9 }
  0x67   : > { %v862_v8 = vpack.c.bf16 %v328_v6, %v327_v5  ;;  %v556_v25 = vld [vmem:[%s1352_s6 + $0x8] sm:$0xff]  ;;  %v555_v26 = vld [vmem:[%s1352_s6] sm:$0xff]  ;;  %v558_v35 = vld [vmem:[%s1352_s6 + $0x18] sm:$0xff]  ;;  %s811_s8 = sshll.u32 %s648_s27, 7  ;;  %s636_s19 = scalar_lea.sflag [#allocation6], %s1346_s26 }
  0x68   : > { %v572_v27 = vmul.f32 0.999, %v556_v25  ;;  %v571_v29 = vmul.f32 0.999, %v555_v26  ;;  %v557_v36 = vld [vmem:[%s1352_s6 + $0x10] sm:$0xff]  ;;  %v560_v45 = vld [vmem:[%s1352_s6 + $0x28] sm:$0xff]  ;;  %s1414_s28 = scalar_lea.hbm %s1487_s3, %s811_s8 }
  0x69   : > { %863 = vmatprep.subr.bf16.mxu0 %v862_v8  ;;  %866 = vmatprep.subr.bf16.mxu1 %v862_v8  ;;  %v574_v37 = vmul.f32 0.999, %v558_v35  ;;  %v573_v39 = vmul.f32 0.999, %v557_v36  ;;  %v559_v46 = vld [vmem:[%s1352_s6 + $0x20] sm:$0xff]  ;;  %v562_v55 = vld [vmem:[%s1352_s6 + $0x38] sm:$0xff] }
  0x6a   : > { %330 = vxpose.xlu0.b32.end [2/2] (short) %v326_v7, 128  ;;  %865 = vmatpush3.bf16.msra.mxu0 %v862_v8  ;;  %v576_v47 = vmul.f32 0.999, %v560_v45  ;;  %v575_v49 = vmul.f32 0.999, %v559_v46  ;;  %v561_v56 = vld [vmem:[%s1352_s6 + $0x30] sm:$0xff]  ;;  %v564_v1 = vld [vmem:[%s1352_s6 + $0x48] sm:$0xff] }
  0x6b   : > { %867 = vmatpush3.bf16.msra.mxu1 %v862_v8  ;;  %v578_v57 = vmul.f32 0.999, %v562_v55  ;;  %v577_v59 = vmul.f32 0.999, %v561_v56  ;;  %v563_v2 = vld [vmem:[%s1352_s6 + $0x40] sm:$0xff]  ;;  %s1008_s24 = scalar_lea.vmem %s1416_s9, 2048 }
  0x6c   : > { %v580_v3 = vmul.f32 0.999, %v564_v1  ;;  %v579_v5 = vmul.f32 0.999, %v563_v2  ;;  %p1009_p0 = scmp.ne.s32.totalorder %s1416_s9, %s1008_s24  ;;  %p1508_p4 = scmp.ne.s32.totalorder %s1504_s30, 0 }
  0x6d   : > { %s1144_s25 = smov [#allocation7]  }
  0x6e   : > { %p1010_p5 = pnand %p1009_p0, %p1508_p4  ;;  %s1012_s7 = sshll.u32 %s1144_s25, 4  ;;  %s1013_s7 = int_to_ptr.vmem [resolvable:$false] %s1012_s7 }
  0x6f   : > { %s1014_s0 = scalar_lea.vmem %s1013_s7, 4096  ;;  %p1015_p13 = scmp.lt.s32.totalorder %s1416_s9, %s1013_s7 }
  0x70   : > { %p1011_p6 = pneg %p1010_p5  ;;  %p1016_p1 = scmp.lt.s32.totalorder %s1014_s0, %s1008_s24 }
  0x72   : > { %p1017_p8 = por %p1016_p1, %p1015_p13 }
  0x74   : > { %p1018_p2 = pnand %p1017_p8, %p1011_p6 }
  0xe6   : > { %v345_v9 = vpop.trf.xlu0 }
  0xe7   : > { %838 = vmatprep.mubr.msk.f32.mxu0 %vm361_vm0, %v345_v9 }
  0xea   : > { %v346_v10 = vpop.trf.xlu0 }
  0xeb   : > { %839 = vmatmul.mubr.msk.f32.vlgmr.msra.gmra.mrb[0].mxu0 %vm361_vm0, %v346_v10 }
  0xee   : > { %v347_v11 = vpop.trf.xlu0 }
  0xef   : > { %841 = vmatprep.mubr.msk.f32.mxu0 %vm361_vm0, %v347_v11  ;;  %v566_v11 = vld [vmem:[%s1352_s6 + $0x58] sm:$0xff] }
  0xf2   : > { %v348_v12 = vpop.trf.xlu0 }
  0xf3   : > { %842 = vmatmul.mubr.msk.f32.gmra.mrb[2].mxu0 %vm361_vm0, %v348_v12  ;;  %v565_v12 = vld [vmem:[%s1352_s6 + $0x50] sm:$0xff] }
  0xf6   : > { %v349_v13 = vpop.trf.xlu0 }
  0xf7   : > { %844 = vmatprep.mubr.msk.f32.mxu0 %vm361_vm0, %v349_v13  ;;  %v582_v13 = vmul.f32 0.999, %v566_v11 }
  0xfa   : > { %v350_v14 = vpop.trf.xlu0 }
  0xfb   : > { %845 = vmatmul.mubr.msk.f32.gmra.mrb[4].mxu0 %vm361_vm0, %v350_v14 }
  0xfe   : > { %v351_v15 = vpop.trf.xlu0 }
  0xff   : > { %847 = vmatprep.mubr.msk.f32.mxu0 %vm361_vm0, %v351_v15  ;;  %v581_v15 = vmul.f32 0.999, %v565_v12 }
 0x102   : > { %v352_v16 = vpop.trf.xlu0 }
 0x103   : > { %848 = vmatmul.mubr.msk.f32.gmra.mrb[6].mxu0 %vm361_vm0, %v352_v16 }
 0x106   : > { %v353_v17 = vpop.trf.xlu0 }
 0x107   : > { %850 = vmatprep.mubr.msk.f32.mxu1 %vm361_vm0, %v353_v17 }
 0x10a   : > { %v354_v18 = vpop.trf.xlu0 }
 0x10b   : > { %851 = vmatmul.mubr.msk.f32.vlgmr.msra.gmra.mrb[0].mxu1 %vm361_vm0, %v354_v18 }
 0x10e   : > { %v355_v19 = vpop.trf.xlu0 }
 0x10f   : > { %853 = vmatprep.mubr.msk.f32.mxu1 %vm361_vm0, %v355_v19 }
 0x112   : > { %v356_v20 = vpop.trf.xlu0 }
 0x113   : > { %854 = vmatmul.mubr.msk.f32.gmra.mrb[2].mxu1 %vm361_vm0, %v356_v20 }
 0x116   : > { %v357_v21 = vpop.trf.xlu0 }
 0x117   : > { %856 = vmatprep.mubr.msk.f32.mxu1 %vm361_vm0, %v357_v21  ;;  %v568_v21 = vld [vmem:[%s1352_s6 + $0x68] sm:$0xff] }
 0x11a   : > { %v358_v22 = vpop.trf.xlu0 }
 0x11b   : > { %857 = vmatmul.mubr.msk.f32.gmra.mrb[4].mxu1 %vm361_vm0, %v358_v22  ;;  %v567_v22 = vld [vmem:[%s1352_s6 + $0x60] sm:$0xff] }
 0x11c   : > { %v583_v25 = vmul.f32 0.999, %v567_v22 }
 0x11e   : > { %v359_v23 = vpop.trf.xlu0 }
 0x11f   : > { %859 = vmatprep.mubr.msk.f32.mxu1 %vm361_vm0, %v359_v23  ;;  %v584_v23 = vmul.f32 0.999, %v568_v21 }
 0x122   : > { %v360_v24 = vpop.trf.xlu0 }
 0x123   : > { %860 = vmatmul.mubr.msk.f32.gmra.mrb[6].mxu1 %vm361_vm0, %v360_v24 }
 0x1be   : > { %v840_v28 = vpop.f32.mrb[0].mxu0 }
 0x1bf   : > { %v588_v30 = vmul.f32 6.25e-05, %v840_v28  ;;  %v476_v31 = vpop.f32.mrb[1].mxu0 }
 0x1c0   : > { %v587_v32 = vmul.f32 6.25e-05, %v476_v31  ;;  %v570_v31 = vld [vmem:[%s1352_s6 + $0x78] sm:$0xff] }
 0x1c1   : > { %v604_v33 = vadd.f32 %v588_v30, %v572_v27 }
 0x1c2   : > { %v603_v34 = vadd.f32 %v587_v32, %v571_v29  ;;  %v569_v32 = vld [vmem:[%s1352_s6 + $0x70] sm:$0xff] }
 0x1c3   : > { %620 = vst [vmem:[%s1379_s15 + $0x8] sm:$0xff] %v604_v33  ;;  %v586_v33 = vmul.f32 0.999, %v570_v31  ;;  %v585_v35 = vmul.f32 0.999, %v569_v32 }
 0x1c4   : > { %619 = vst [vmem:[%s1379_s15] sm:$0xff] %v603_v34 }
 0x1c6   : > { %v843_v38 = vpop.f32.mrb[2].mxu0 }
 0x1c7   : > { %v590_v40 = vmul.f32 6.25e-05, %v843_v38  ;;  %v486_v41 = vpop.f32.mrb[3].mxu0 }
 0x1c8   : > { %v589_v42 = vmul.f32 6.25e-05, %v486_v41 }
 0x1c9   : > { %v606_v43 = vadd.f32 %v590_v40, %v574_v37 }
 0x1ca   : > { %v605_v44 = vadd.f32 %v589_v42, %v573_v39 }
 0x1cb   : > { %622 = vst [vmem:[%s1379_s15 + $0x18] sm:$0xff] %v606_v43 }
 0x1cc   : > { %621 = vst [vmem:[%s1379_s15 + $0x10] sm:$0xff] %v605_v44 }
 0x1ce   : > { %v846_v48 = vpop.f32.mrb[4].mxu0 }
 0x1cf   : > { %v592_v50 = vmul.f32 6.25e-05, %v846_v48  ;;  %v496_v51 = vpop.f32.mrb[5].mxu0 }
 0x1d0   : > { %v591_v52 = vmul.f32 6.25e-05, %v496_v51 }
 0x1d1   : > { %v608_v53 = vadd.f32 %v592_v50, %v576_v47 }
 0x1d2   : > { %v607_v54 = vadd.f32 %v591_v52, %v575_v49 }
 0x1d3   : > { %624 = vst [vmem:[%s1379_s15 + $0x28] sm:$0xff] %v608_v53 }
 0x1d4   : > { %623 = vst [vmem:[%s1379_s15 + $0x20] sm:$0xff] %v607_v54 }
 0x1d6   : > { %v849_v58 = vpop.f32.mrb[6].mxu0 }
 0x1d7   : > { %v594_v60 = vmul.f32 6.25e-05, %v849_v58  ;;  %v506_v61 = vpop.f32.mrb[7].mxu0 }
 0x1d8   : > { %v593_v62 = vmul.f32 6.25e-05, %v506_v61 }
 0x1d9   : > { %v610_v63 = vadd.f32 %v594_v60, %v578_v57 }
 0x1da   : > { %v609_v0 = vadd.f32 %v593_v62, %v577_v59 }
 0x1db   : > { %626 = vst [vmem:[%s1379_s15 + $0x38] sm:$0xff] %v610_v63 }
 0x1dc   : > { %625 = vst [vmem:[%s1379_s15 + $0x30] sm:$0xff] %v609_v0 }
 0x1de   : > { %v852_v4 = vpop.f32.mrb[0].mxu1 }
 0x1df   : > { %v596_v6 = vmul.f32 6.25e-05, %v852_v4  ;;  %v516_v7 = vpop.f32.mrb[1].mxu1 }
 0x1e0   : > { %v595_v8 = vmul.f32 6.25e-05, %v516_v7 }
 0x1e1   : > { %v612_v9 = vadd.f32 %v596_v6, %v580_v3 }
 0x1e2   : > { %v611_v10 = vadd.f32 %v595_v8, %v579_v5 }
 0x1e3   : > { %628 = vst [vmem:[%s1379_s15 + $0x48] sm:$0xff] %v612_v9 }
 0x1e4   : > { %627 = vst [vmem:[%s1379_s15 + $0x40] sm:$0xff] %v611_v10 }
 0x1e6   : > { %v855_v14 = vpop.f32.mrb[2].mxu1 }
 0x1e7   : > { %v598_v16 = vmul.f32 6.25e-05, %v855_v14  ;;  %v526_v17 = vpop.f32.mrb[3].mxu1 }
 0x1e8   : > { %v597_v18 = vmul.f32 6.25e-05, %v526_v17 }
 0x1e9   : > { %v614_v19 = vadd.f32 %v598_v16, %v582_v13 }
 0x1ea   : > { %v613_v20 = vadd.f32 %v597_v18, %v581_v15 }
 0x1eb   : > { %630 = vst [vmem:[%s1379_s15 + $0x58] sm:$0xff] %v614_v19 }
 0x1ec   : > { %629 = vst [vmem:[%s1379_s15 + $0x50] sm:$0xff] %v613_v20 }
 0x1ee   : > { %v858_v24 = vpop.f32.mrb[4].mxu1 }
 0x1ef   : > { %v600_v26 = vmul.f32 6.25e-05, %v858_v24  ;;  %v536_v27 = vpop.f32.mrb[5].mxu1 }
 0x1f0   : > { %v599_v28 = vmul.f32 6.25e-05, %v536_v27 }
 0x1f1   : > { %v616_v29 = vadd.f32 %v600_v26, %v584_v23 }
 0x1f2   : > { %v615_v30 = vadd.f32 %v599_v28, %v583_v25 }
 0x1f3   : > { %632 = vst [vmem:[%s1379_s15 + $0x68] sm:$0xff] %v616_v29 }
 0x1f4   : > { %631 = vst [vmem:[%s1379_s15 + $0x60] sm:$0xff] %v615_v30 }
 0x1f6   : > { %v861_v34 = vpop.f32.mrb[6].mxu1 }
 0x1f7   : > { %v602_v36 = vmul.f32 6.25e-05, %v861_v34  ;;  %v546_v37 = vpop.f32.mrb[7].mxu1 }
 0x1f8   : > { %v601_v38 = vmul.f32 6.25e-05, %v546_v37 }
 0x1f9   : > { %v618_v39 = vadd.f32 %v602_v36, %v586_v33 }
 0x1fa   : > { %v617_v40 = vadd.f32 %v601_v38, %v585_v35 }
 0x1fb   : > { %634 = vst [vmem:[%s1379_s15 + $0x78] sm:$0xff] %v618_v39 }
 0x1fc   : > { %633 = vst [vmem:[%s1379_s15 + $0x70] sm:$0xff] %v617_v40 }
 0x1fd   : > { %1021 = shalt.err (!%p1018_p2)
}
 0x1fe   : > { %s1022_s10 = scalar_lea.hbm %s1414_s28, 2048  ;;  %s1026_s5 = scalar_lea.hbm %s1487_s3, 8192 }
 0x1ff   : > { %p1023_p3 = scmp.ne.s32.totalorder %s1414_s28, %s1022_s10  ;;  %p1027_p7 = scmp.lt.u32.totalorder %s1414_s28, %s1487_s3 }
 0x200   : > { %p1028_p11 = scmp.lt.u32.totalorder %s1026_s5, %s1022_s10  ;;  %p1030_p0 = scmp.lt.u32.totalorder %s1022_s10, %s1414_s28 }
 0x201   : > { %p1024_p9 = pnand %p1023_p3, %p1508_p4 }
 0x202   : > { %p1029_p12 = por %p1028_p11, %p1027_p7 }
 0x203   : > { %p1025_p10 = pneg %p1024_p9 }
 0x204   : > { %p1031_p5 = por %p1030_p0, %p1029_p12 }
 0x206   : > { %p1032_p6 = pnand %p1031_p5, %p1025_p10 }
 0x208   : > { %1035 = shalt.err (!%p1032_p6)
}
 0x209   : > { %s1145_s15 = smov 128   ;;  %s1146_s17 = smov 256  }
 0x20a   : > { %s1147_s27 = smov 8  }
 0x20b   : > { %870 = dma.vmem_to_hbm [thread:$0]  (%p1508_p4), %s1416_s9, 2048, %s1414_s28, %s636_s19, %s1145_s15, %s1146_s17, %s1147_s27  }
 0x20c PF: > { %s1509_s8 = sld [smem:[#allocation16_spill]]  ;;  %p876_p13 = scmp.ge.s32.totalorder %s1138_s23, 2 }
 0x20d   : > { %s666_s20 = sand.u32 1, %s1094_s12  }
 0x20e   : > { %s667_s11 = scalar_lea.sflag [#allocation6], %s666_s20 }
 0x212   : > { %p1510_p1 = scmp.ne.s32.totalorder %s1509_s8, 0 }
 0x214   : > { %p873_p8 = pnand %p876_p13, %p1510_p1 }
 0x216   : > { %1089 = dma.done.wait (!%p873_p8), %s667_s11, 2048  }
 0x217   : > { %1091 = vsyncadd (!%p873_p8), %s667_s11, 4294965248  ;;  %s19_s23 = sadd.s32 1, %s1138_s23   ;;  %s1511_s24 = sld [smem:[#allocation15_spill]] }
 0x218   : > { %p16_p2 = scmp.ge.s32.totalorder %s19_s23, 6   ;;  %s1512_s30 = sld [smem:[#allocation13_spill]] }
 0x219   : > { %s1513_s17 = sld [smem:[#allocation10_spill]]  ;;  %s1514_s18 = sld [smem:[#allocation14_spill]] }
 0x21a   : > { %s1515_s26 = sld [smem:[#allocation11_spill]]  ;;  %s1516_s9 = sld [smem:[#allocation12_spill]] }
 0x21b   : > { %s1517_s12 = smov %s1098_s13  ;;  %s1518_s13 = smov %s1102_s14 }
 0x21c   : > { %s1520_s15 = smov %s1110_s16  ;;  %s1522_s19 = smov %s1130_s21 }
 0x21d   : > { %s1519_s14 = smov %s1511_s24  ;;  %s1523_s20 = smov %s1134_s22 }
 0x21e   : > { %s1521_s16 = smov %s1512_s30  ;;  %18 = sbr.rel (!%p16_p2) target bundleno = 11 (0xb), region = 169 }
 0x220   : > { %s1524_s21 = smov %s1515_s26  ;;  %s1525_s22 = smov %s1516_s9 }
 0x225   :  { %672 = vsyncpa [#allocation5], 1 }
 0x226   :  { %674 = vsyncpa [#allocation5 + $0x1], 1 }
 0x227   :  { %675 = vsyncpa [#allocation6], 1 }
 0x228   :  { %677 = vsyncpa [#allocation6 + $0x1], 1 }

</bundles_post_ra>
